<compile_context>
chip_gen: v7x
topology: tpu7x:2x2x1
jax: 0.10.0
libtpu: 0.0.40
codegen_flags: <defaults>
</compile_context>

<pallas_src>
import functools

import jax
import jax.numpy as jnp
from jax.experimental import pallas as pl
from jax.experimental.pallas import tpu as pltpu

_LN_EPS = 1e-5  # torch.nn.LayerNorm default


def _round_up(x, m):
    return ((x + m - 1) // m) * m


def _cls_decoder_kernel(x_ref, wh_ref, bh_ref, g_ref, be_ref, wo_ref, bo_ref,
                        o_ref, *, n_hidden, eps):
    h = x_ref[...].astype(jnp.float32)                       # (TM, D)
    for l in range(n_hidden):                                # static unroll
        w = wh_ref[l].astype(jnp.float32)                    # (D, D)
        b = bh_ref[l].astype(jnp.float32)                    # (1, D)
        h = jnp.dot(h, w, preferred_element_type=jnp.float32) + b   # MXU
        h = jnp.maximum(h, 0.0)                              # ReLU (VPU)
        mu = jnp.mean(h, axis=-1, keepdims=True)             # XLU reduce
        var = jnp.mean(jnp.square(h - mu), axis=-1, keepdims=True)
        h = (h - mu) * jax.lax.rsqrt(var + eps)              # EUP rsqrt
        h = h * g_ref[l].astype(jnp.float32) + be_ref[l].astype(jnp.float32)
    out = jnp.dot(h, wo_ref[...].astype(jnp.float32),
                  preferred_element_type=jnp.float32)        # (TM, C_pad)
    out = out + bo_ref[...].astype(jnp.float32)
    o_ref[...] = out.astype(o_ref.dtype)


def cls_decoder_forward(x, params, *, eps=_LN_EPS, row_tile=None):
    """Pallas equivalent of ClsDecoder.forward.

    params:
      w_hidden [L, D, D], b_hidden [L, D], gamma [L, D], beta [L, D],
      w_out [D, C], b_out [C]      (L = nlayers - 1)
    """
    wh = params["w_hidden"]
    bh = params["b_hidden"]
    g = params["gamma"]
    be = params["beta"]
    wo = params["w_out"]
    bo = params["b_out"]

    L, D, _ = wh.shape
    n_cls = wo.shape[1]

    # ---- wrapper glue: flatten leading dims to rows ----
    lead_shape = x.shape[:-1]
    N = 1
    for d in lead_shape:
        N *= d
    x2d = x.reshape(N, D)

    # ---- lane-dense output: pad class dim to a multiple of 128 ----
    n_cls_pad = _round_up(n_cls, 128)
    if n_cls_pad != n_cls:
        wo = jnp.pad(wo, ((0, 0), (0, n_cls_pad - n_cls)))
        bo = jnp.pad(bo, (0, n_cls_pad - n_cls))

    bh3 = bh.reshape(L, 1, D)
    g3 = g.reshape(L, 1, D)
    be3 = be.reshape(L, 1, D)
    bo2 = bo.reshape(1, n_cls_pad)

    # ---- row tile: ~2 MiB of activations per step, capped for VMEM safety ----
    if row_tile is None:
        row_tile = max(8, (2 << 20) // max(D * 4, 1))
        row_tile = min(row_tile, 1024)                 # v5e/v7x VMEM headroom
        row_tile = min(row_tile, max(N, 1))
    row_tile = max(8, _round_up(row_tile, 8))

    N_pad = _round_up(max(N, 1), row_tile)
    if N_pad != N:
        x2d = jnp.pad(x2d, ((0, N_pad - N), (0, 0)))

    # TODO(synk): for very large d_model the resident [L, D, D] weight block no
    # longer fits VMEM; it would need a K-tiled accumulation loop per layer.

    kernel = functools.partial(_cls_decoder_kernel, n_hidden=L, eps=eps)

    out = pl.pallas_call(
        kernel,
        out_shape=jax.ShapeDtypeStruct((N_pad, n_cls_pad), jnp.float32),
        grid_spec=pltpu.PrefetchScalarGridSpec(
            num_scalar_prefetch=0,
            grid=(N_pad // row_tile,),
            in_specs=[
                pl.BlockSpec((row_tile, D), lambda i: (i, 0)),     # x rows
                pl.BlockSpec((L, D, D), lambda i: (0, 0, 0)),      # hidden W
                pl.BlockSpec((L, 1, D), lambda i: (0, 0, 0)),      # hidden b
                pl.BlockSpec((L, 1, D), lambda i: (0, 0, 0)),      # LN gamma
                pl.BlockSpec((L, 1, D), lambda i: (0, 0, 0)),      # LN beta
                pl.BlockSpec((D, n_cls_pad), lambda i: (0, 0)),    # out W
                pl.BlockSpec((1, n_cls_pad), lambda i: (0, 0)),    # out b
            ],
            out_specs=pl.BlockSpec((row_tile, n_cls_pad), lambda i: (i, 0)),
        ),
        compiler_params=pltpu.CompilerParams(
            dimension_semantics=("parallel",),
        ),
    )(x2d, wh, bh3, g3, be3, wo, bo2)

    return out[:N, :n_cls].reshape(*lead_shape, n_cls)


# ---------------------------------------------------------------------------


def _init_params(key, d_model, n_cls, nlayers):
    L = nlayers - 1
    ks = jax.random.split(key, 2 * L + 2)
    scale = 1.0 / jnp.sqrt(jnp.float32(d_model))
    w_hidden = jax.random.normal(ks[0], (L, d_model, d_model), jnp.float32) * scale
    b_hidden = jax.random.normal(ks[1], (L, d_model), jnp.float32) * 0.1
    gamma = 1.0 + 0.1 * jax.random.normal(ks[2], (L, d_model), jnp.float32)
    beta = 0.1 * jax.random.normal(ks[3], (L, d_model), jnp.float32)
    w_out = jax.random.normal(ks[4], (d_model, n_cls), jnp.float32) * scale
    b_out = 0.1 * jax.random.normal(ks[5], (n_cls,), jnp.float32)
    return {
        "w_hidden": w_hidden, "b_hidden": b_hidden,
        "gamma": gamma, "beta": beta,
        "w_out": w_out, "b_out": b_out,
    }


def _ref_forward(x, params, eps=_LN_EPS):
    h = x.astype(jnp.float32)
    L = params["w_hidden"].shape[0]
    for l in range(L):
        h = h @ params["w_hidden"][l] + params["b_hidden"][l]
        h = jnp.maximum(h, 0.0)
        mu = h.mean(-1, keepdims=True)
        var = ((h - mu) ** 2).mean(-1, keepdims=True)
        h = (h - mu) / jnp.sqrt(var + eps)
        h = h * params["gamma"][l] + params["beta"][l]
    return h @ params["w_out"] + params["b_out"]


if __name__ == "__main__":
    key = jax.random.PRNGKey(0)
    k_params, k_x = jax.random.split(key)

    batch, d_model, n_cls, nlayers = 4, 32, 10, 3
    params = _init_params(k_params, d_model, n_cls, nlayers)
    x = jax.random.normal(k_x, (batch, d_model), dtype=jnp.float32)

    out = cls_decoder_forward(x, params)
    out = jax.block_until_ready(out)

    ref = _ref_forward(x, params)
    assert out.shape == (batch, n_cls), out.shape
    assert jnp.allclose(out, ref, atol=1e-4, rtol=1e-4), (
        float(jnp.max(jnp.abs(out - ref))))

    print("KERNEL_OK")
</pallas_src>

<mosaic_0001>
module attributes {stable_mosaic.version = 11 : i64} {
  func.func @_cls_decoder_kernel(%arg0: i32, %arg1: memref<8x32xf32, #tpu.memory_space<vmem>>, %arg2: memref<2x32x32xf32, #tpu.memory_space<vmem>>, %arg3: memref<2x1x32xf32, #tpu.memory_space<vmem>>, %arg4: memref<2x1x32xf32, #tpu.memory_space<vmem>>, %arg5: memref<2x1x32xf32, #tpu.memory_space<vmem>>, %arg6: memref<32x128xf32, #tpu.memory_space<vmem>>, %arg7: memref<1x128xf32, #tpu.memory_space<vmem>>, %arg8: memref<8x128xf32, #tpu.memory_space<vmem>>) attributes {dimension_semantics = [#tpu.dimension_semantics<parallel>], iteration_bounds = array<i64: 1>, scalar_prefetch = 0 : i64, scratch_operands = 0 : i64, tpu.core_type = #tpu.core_type<tc>, window_params = [{transform_indices = @transform_0, window_bounds = array<i64: 8, 32>}, {pipeline_mode = #tpu.pipeline_mode<synchronous>, transform_indices = @transform_1, window_bounds = array<i64: 2, 32, 32>}, {pipeline_mode = #tpu.pipeline_mode<synchronous>, transform_indices = @transform_2, window_bounds = array<i64: 2, 1, 32>}, {pipeline_mode = #tpu.pipeline_mode<synchronous>, transform_indices = @transform_3, window_bounds = array<i64: 2, 1, 32>}, {pipeline_mode = #tpu.pipeline_mode<synchronous>, transform_indices = @transform_4, window_bounds = array<i64: 2, 1, 32>}, {pipeline_mode = #tpu.pipeline_mode<synchronous>, transform_indices = @transform_5, window_bounds = array<i64: 32, 128>}, {pipeline_mode = #tpu.pipeline_mode<synchronous>, transform_indices = @transform_6, window_bounds = array<i64: 1, 128>}, {transform_indices = @transform_7, window_bounds = array<i64: 8, 128>}]} {
    %c0 = arith.constant 0 : index
    %c0_0 = arith.constant 0 : index
    %0 = vector.load %arg1[%c0, %c0_0] : memref<8x32xf32, #tpu.memory_space<vmem>>, vector<8x32xf32>
    %c0_1 = arith.constant 0 : index
    %c0_2 = arith.constant 0 : index
    %c0_3 = arith.constant 0 : index
    %1 = vector.load %arg2[%c0_1, %c0_2, %c0_3] : memref<2x32x32xf32, #tpu.memory_space<vmem>>, vector<1x32x32xf32>
    %2 = vector.shape_cast %1 : vector<1x32x32xf32> to vector<32x32xf32>
    %c0_4 = arith.constant 0 : index
    %c0_5 = arith.constant 0 : index
    %c0_6 = arith.constant 0 : index
    %3 = vector.load %arg3[%c0_4, %c0_5, %c0_6] : memref<2x1x32xf32, #tpu.memory_space<vmem>>, vector<1x1x32xf32>
    %4 = vector.shape_cast %3 : vector<1x1x32xf32> to vector<1x32xf32>
    %cst = arith.constant dense<0.000000e+00> : vector<8x32xf32>
    %5 = tpu.matmul %0, %2, %cst {dimension_numbers = #tpu.dot_dimension_numbers<[1], [0], [0], [1], [0, 0, 1, 1], [], []>} : vector<8x32xf32>, vector<32x32xf32>, vector<8x32xf32> -> vector<8x32xf32>
    %6 = vector.broadcast %4 : vector<1x32xf32> to vector<8x32xf32>
    %7 = arith.addf %5, %6 : vector<8x32xf32>
    %cst_7 = arith.constant 0.000000e+00 : f32
    %8 = vector.broadcast %cst_7 : f32 to vector<8x32xf32>
    %9 = arith.maximumf %7, %8 : vector<8x32xf32>
    %cst_8 = arith.constant dense<0.000000e+00> : vector<8xf32>
    %10 = vector.multi_reduction <add>, %9, %cst_8 [1] : vector<8x32xf32> to vector<8xf32>
    %11 = vector.shape_cast %10 : vector<8xf32> to vector<8x1xf32>
    %cst_9 = arith.constant 3.200000e+01 : f32
    %12 = vector.broadcast %cst_9 : f32 to vector<8x1xf32>
    %13 = arith.divf %11, %12 : vector<8x1xf32>
    %14 = vector.broadcast %13 : vector<8x1xf32> to vector<8x32xf32>
    %15 = arith.subf %9, %14 : vector<8x32xf32>
    %16 = arith.mulf %15, %15 : vector<8x32xf32>
    %cst_10 = arith.constant dense<0.000000e+00> : vector<8xf32>
    %17 = vector.multi_reduction <add>, %16, %cst_10 [1] : vector<8x32xf32> to vector<8xf32>
    %18 = vector.shape_cast %17 : vector<8xf32> to vector<8x1xf32>
    %cst_11 = arith.constant 3.200000e+01 : f32
    %19 = vector.broadcast %cst_11 : f32 to vector<8x1xf32>
    %20 = arith.divf %18, %19 : vector<8x1xf32>
    %21 = vector.broadcast %13 : vector<8x1xf32> to vector<8x32xf32>
    %22 = arith.subf %9, %21 : vector<8x32xf32>
    %cst_12 = arith.constant 9.99999974E-6 : f32
    %23 = vector.broadcast %cst_12 : f32 to vector<8x1xf32>
    %24 = arith.addf %20, %23 : vector<8x1xf32>
    %25 = math.rsqrt %24 : vector<8x1xf32>
    %26 = vector.broadcast %25 : vector<8x1xf32> to vector<8x32xf32>
    %27 = arith.mulf %22, %26 : vector<8x32xf32>
    %c0_13 = arith.constant 0 : index
    %c0_14 = arith.constant 0 : index
    %c0_15 = arith.constant 0 : index
    %28 = vector.load %arg4[%c0_13, %c0_14, %c0_15] : memref<2x1x32xf32, #tpu.memory_space<vmem>>, vector<1x1x32xf32>
    %29 = vector.shape_cast %28 : vector<1x1x32xf32> to vector<1x32xf32>
    %30 = vector.broadcast %29 : vector<1x32xf32> to vector<8x32xf32>
    %31 = arith.mulf %27, %30 : vector<8x32xf32>
    %c0_16 = arith.constant 0 : index
    %c0_17 = arith.constant 0 : index
    %c0_18 = arith.constant 0 : index
    %32 = vector.load %arg5[%c0_16, %c0_17, %c0_18] : memref<2x1x32xf32, #tpu.memory_space<vmem>>, vector<1x1x32xf32>
    %33 = vector.shape_cast %32 : vector<1x1x32xf32> to vector<1x32xf32>
    %34 = vector.broadcast %33 : vector<1x32xf32> to vector<8x32xf32>
    %35 = arith.addf %31, %34 : vector<8x32xf32>
    %c1 = arith.constant 1 : index
    %c0_19 = arith.constant 0 : index
    %c0_20 = arith.constant 0 : index
    %36 = vector.load %arg2[%c1, %c0_19, %c0_20] : memref<2x32x32xf32, #tpu.memory_space<vmem>>, vector<1x32x32xf32>
    %37 = vector.shape_cast %36 : vector<1x32x32xf32> to vector<32x32xf32>
    %c1_21 = arith.constant 1 : index
    %c0_22 = arith.constant 0 : index
    %c0_23 = arith.constant 0 : index
    %38 = vector.load %arg3[%c1_21, %c0_22, %c0_23] : memref<2x1x32xf32, #tpu.memory_space<vmem>>, vector<1x1x32xf32>
    %39 = vector.shape_cast %38 : vector<1x1x32xf32> to vector<1x32xf32>
    %cst_24 = arith.constant dense<0.000000e+00> : vector<8x32xf32>
    %40 = tpu.matmul %35, %37, %cst_24 {dimension_numbers = #tpu.dot_dimension_numbers<[1], [0], [0], [1], [0, 0, 1, 1], [], []>} : vector<8x32xf32>, vector<32x32xf32>, vector<8x32xf32> -> vector<8x32xf32>
    %41 = vector.broadcast %39 : vector<1x32xf32> to vector<8x32xf32>
    %42 = arith.addf %40, %41 : vector<8x32xf32>
    %cst_25 = arith.constant 0.000000e+00 : f32
    %43 = vector.broadcast %cst_25 : f32 to vector<8x32xf32>
    %44 = arith.maximumf %42, %43 : vector<8x32xf32>
    %cst_26 = arith.constant dense<0.000000e+00> : vector<8xf32>
    %45 = vector.multi_reduction <add>, %44, %cst_26 [1] : vector<8x32xf32> to vector<8xf32>
    %46 = vector.shape_cast %45 : vector<8xf32> to vector<8x1xf32>
    %cst_27 = arith.constant 3.200000e+01 : f32
    %47 = vector.broadcast %cst_27 : f32 to vector<8x1xf32>
    %48 = arith.divf %46, %47 : vector<8x1xf32>
    %49 = vector.broadcast %48 : vector<8x1xf32> to vector<8x32xf32>
    %50 = arith.subf %44, %49 : vector<8x32xf32>
    %51 = arith.mulf %50, %50 : vector<8x32xf32>
    %cst_28 = arith.constant dense<0.000000e+00> : vector<8xf32>
    %52 = vector.multi_reduction <add>, %51, %cst_28 [1] : vector<8x32xf32> to vector<8xf32>
    %53 = vector.shape_cast %52 : vector<8xf32> to vector<8x1xf32>
    %cst_29 = arith.constant 3.200000e+01 : f32
    %54 = vector.broadcast %cst_29 : f32 to vector<8x1xf32>
    %55 = arith.divf %53, %54 : vector<8x1xf32>
    %56 = vector.broadcast %48 : vector<8x1xf32> to vector<8x32xf32>
    %57 = arith.subf %44, %56 : vector<8x32xf32>
    %cst_30 = arith.constant 9.99999974E-6 : f32
    %58 = vector.broadcast %cst_30 : f32 to vector<8x1xf32>
    %59 = arith.addf %55, %58 : vector<8x1xf32>
    %60 = math.rsqrt %59 : vector<8x1xf32>
    %61 = vector.broadcast %60 : vector<8x1xf32> to vector<8x32xf32>
    %62 = arith.mulf %57, %61 : vector<8x32xf32>
    %c1_31 = arith.constant 1 : index
    %c0_32 = arith.constant 0 : index
    %c0_33 = arith.constant 0 : index
    %63 = vector.load %arg4[%c1_31, %c0_32, %c0_33] : memref<2x1x32xf32, #tpu.memory_space<vmem>>, vector<1x1x32xf32>
    %64 = vector.shape_cast %63 : vector<1x1x32xf32> to vector<1x32xf32>
    %65 = vector.broadcast %64 : vector<1x32xf32> to vector<8x32xf32>
    %66 = arith.mulf %62, %65 : vector<8x32xf32>
    %c1_34 = arith.constant 1 : index
    %c0_35 = arith.constant 0 : index
    %c0_36 = arith.constant 0 : index
    %67 = vector.load %arg5[%c1_34, %c0_35, %c0_36] : memref<2x1x32xf32, #tpu.memory_space<vmem>>, vector<1x1x32xf32>
    %68 = vector.shape_cast %67 : vector<1x1x32xf32> to vector<1x32xf32>
    %69 = vector.broadcast %68 : vector<1x32xf32> to vector<8x32xf32>
    %70 = arith.addf %66, %69 : vector<8x32xf32>
    %c0_37 = arith.constant 0 : index
    %c0_38 = arith.constant 0 : index
    %71 = vector.load %arg6[%c0_37, %c0_38] : memref<32x128xf32, #tpu.memory_space<vmem>>, vector<32x128xf32>
    %cst_39 = arith.constant dense<0.000000e+00> : vector<8x128xf32>
    %72 = tpu.matmul %70, %71, %cst_39 {dimension_numbers = #tpu.dot_dimension_numbers<[1], [0], [0], [1], [0, 0, 1, 1], [], []>} : vector<8x32xf32>, vector<32x128xf32>, vector<8x128xf32> -> vector<8x128xf32>
    %c0_40 = arith.constant 0 : index
    %c0_41 = arith.constant 0 : index
    %73 = vector.load %arg7[%c0_40, %c0_41] : memref<1x128xf32, #tpu.memory_space<vmem>>, vector<1x128xf32>
    %74 = vector.broadcast %73 : vector<1x128xf32> to vector<8x128xf32>
    %75 = arith.addf %72, %74 : vector<8x128xf32>
    %c0_42 = arith.constant 0 : index
    %c0_43 = arith.constant 0 : index
    %76 = vector.load %arg8[%c0_42, %c0_43] : memref<8x128xf32, #tpu.memory_space<vmem>>, vector<8x128xf32>
    tpu.vector_store %arg8[%c0_42, %c0_43], %75 {strides = array<i32>} : memref<8x128xf32, #tpu.memory_space<vmem>>, vector<8x128xf32>,
    return
  }
  func.func @transform_0(%arg0: i32) -> (i32, i32) {
    %c0_i32 = arith.constant 0 : i32
    %c0_i32_0 = arith.constant 0 : i32
    return %arg0, %c0_i32 : i32, i32
  }
  func.func @transform_1(%arg0: i32) -> (i32, i32, i32) {
    %c0_i32 = arith.constant 0 : i32
    %c0_i32_0 = arith.constant 0 : i32
    %c0_i32_1 = arith.constant 0 : i32
    %c0_i32_2 = arith.constant 0 : i32
    return %c0_i32, %c0_i32_0, %c0_i32_1 : i32, i32, i32
  }
  func.func @transform_2(%arg0: i32) -> (i32, i32, i32) {
    %c0_i32 = arith.constant 0 : i32
    %c0_i32_0 = arith.constant 0 : i32
    %c0_i32_1 = arith.constant 0 : i32
    %c0_i32_2 = arith.constant 0 : i32
    return %c0_i32, %c0_i32_0, %c0_i32_1 : i32, i32, i32
  }
  func.func @transform_3(%arg0: i32) -> (i32, i32, i32) {
    %c0_i32 = arith.constant 0 : i32
    %c0_i32_0 = arith.constant 0 : i32
    %c0_i32_1 = arith.constant 0 : i32
    %c0_i32_2 = arith.constant 0 : i32
    return %c0_i32, %c0_i32_0, %c0_i32_1 : i32, i32, i32
  }
  func.func @transform_4(%arg0: i32) -> (i32, i32, i32) {
    %c0_i32 = arith.constant 0 : i32
    %c0_i32_0 = arith.constant 0 : i32
    %c0_i32_1 = arith.constant 0 : i32
    %c0_i32_2 = arith.constant 0 : i32
    return %c0_i32, %c0_i32_0, %c0_i32_1 : i32, i32, i32
  }
  func.func @transform_5(%arg0: i32) -> (i32, i32) {
    %c0_i32 = arith.constant 0 : i32
    %c0_i32_0 = arith.constant 0 : i32
    %c0_i32_1 = arith.constant 0 : i32
    return %c0_i32, %c0_i32_0 : i32, i32
  }
  func.func @transform_6(%arg0: i32) -> (i32, i32) {
    %c0_i32 = arith.constant 0 : i32
    %c0_i32_0 = arith.constant 0 : i32
    %c0_i32_1 = arith.constant 0 : i32
    return %c0_i32, %c0_i32_0 : i32, i32
  }
  func.func @transform_7(%arg0: i32) -> (i32, i32) {
    %c0_i32 = arith.constant 0 : i32
    %c0_i32_0 = arith.constant 0 : i32
    return %arg0, %c0_i32 : i32, i32
  }
}

</mosaic_0001>

<bundles_post_ra>
// kernel: tpu_custom_call.1
= control target key start
LH: loop header
LB: loop body
LE: loop exit
PB: predicated region body
PF: predicated region fallthrough
CT: control target
= control target key end

     0   :  { %12 = vsyncpa [#allocation3], 0  ;;  %s728_s0 = inlined_call_operand.hbm [shape: f32[8,32], index: 0, kind: input, shape index: {}]   ;;  %s729_s1 = inlined_call_operand.hbm [shape: f32[2,32,32], index: 1, kind: input, shape index: {}]   ;;  %s730_s2 = inlined_call_operand.vmem [shape: f32[2,1,32], index: 2, kind: input, shape index: {}]   ;;  %s731_s3 = inlined_call_operand.vmem [shape: f32[2,1,32], index: 3, kind: input, shape index: {}]   ;;  %s732_s4 = inlined_call_operand.vmem [shape: f32[2,1,32], index: 4, kind: input, shape index: {}]   ;;  %s733_s5 = inlined_call_operand.hbm [shape: f32[32,128], index: 5, kind: input, shape index: {}]   ;;  %s734_s6 = inlined_call_operand.vmem [shape: f32[1,128], index: 6, kind: input, shape index: {}]   ;;  %s735_s7 = inlined_call_operand.hbm [shape: f32[8,128], index: 7, kind: output, shape index: {}]  }
   0x1   :  { %13 = vsyncpa [#allocation6], 0 }
   0x2   :  { %14 = vsyncpa [#allocation4], 0  ;;  %s588_s24 = smov [#allocation5]   ;;  %s494_s28 = scalar_lea.hbm %s729_s1, 1024 }
   0x3   :  { %s30_s25 = sshll.u32 %s588_s24, 4  ;;  %p495_p0 = scmp.ne.s32.totalorder %s729_s1, %s494_s28  ;;  %s31_s25 = int_to_ptr.vmem [resolvable:$true] %s30_s25 }
   0x4   :  { %p498_p1 = scmp.lt.u32.totalorder %s494_s28, %s729_s1 }
   0x6   :  { %p500_p2 = pnand %p498_p1, %p495_p0 }
   0x8   :  { %503 = shalt.err (!%p500_p2)
}
   0x9   :  { %s504_s10 = scalar_lea.vmem %s31_s25, 1024  ;;  %p509_p4 = scmp.lt.s32.totalorder %s31_s25, %s31_s25 }
   0xa   :  { %p505_p3 = scmp.ne.s32.totalorder %s31_s25, %s504_s10  ;;  %p510_p5 = scmp.lt.s32.totalorder %s504_s10, %s504_s10 }
   0xc   :  { %p511_p6 = por %p510_p5, %p509_p4 }
   0xe   :  { %p512_p7 = pnand %p511_p6, %p505_p3 }
  0x10   :  { %515 = shalt.err (!%p512_p7)
}
  0x11   :  { %s589_s11 = smov 128   ;;  %s590_s12 = smov 8  }
  0x12   :  { %36 = dma.hbm_to_vmem [thread:$0]  %s729_s1, 1024, %s31_s25, [#allocation6], %s589_s11, %s589_s11, %s590_s12  }
  0x13   :  { %s591_s15 = smov [#allocation2]   ;;  %s592_s17 = smov [#allocation7]  }
  0x14   :  { %s21_s16 = sshll.u32 %s591_s15, 4  ;;  %s48_s18 = sshll.u32 %s592_s17, 4  ;;  %s22_s16 = int_to_ptr.vmem [resolvable:$true] %s21_s16  ;;  %s49_s18 = int_to_ptr.vmem [resolvable:$true] %s48_s18 }
  0x15   :  { %s516_s21 = scalar_lea.hbm %s728_s0, 128 }
  0x16   :  { %p517_p8 = scmp.ne.s32.totalorder %s728_s0, %s516_s21  ;;  %p520_p9 = scmp.lt.u32.totalorder %s516_s21, %s728_s0 }
  0x18   :  { %p522_p10 = pnand %p520_p9, %p517_p8 }
  0x1a   :  { %525 = shalt.err (!%p522_p10)
}
  0x1b   :  { %s526_s1 = scalar_lea.vmem %s22_s16, 128  ;;  %p531_p12 = scmp.lt.s32.totalorder %s22_s16, %s22_s16 }
  0x1c   :  { %p527_p11 = scmp.ne.s32.totalorder %s22_s16, %s526_s1  ;;  %p532_p13 = scmp.lt.s32.totalorder %s526_s1, %s526_s1 }
  0x1e   :  { %p533_p0 = por %p532_p13, %p531_p12 }
  0x20   :  { %p534_p1 = pnand %p533_p0, %p527_p11 }
  0x22   :  { %537 = shalt.err (!%p534_p1)
}
  0x23   :  { %24 = dma.hbm_to_vmem [thread:$0]  %s728_s0, 128, %s22_s16, [#allocation3]  }
  0x24   :  { %s538_s30 = scalar_lea.hbm %s733_s5, 512 }
  0x25   :  { %p539_p2 = scmp.ne.s32.totalorder %s733_s5, %s538_s30  ;;  %p542_p3 = scmp.lt.u32.totalorder %s538_s30, %s733_s5 }
  0x27   :  { %p544_p4 = pnand %p542_p3, %p539_p2 }
  0x29   :  { %547 = shalt.err (!%p544_p4)
}
  0x2a   :  { %s548_s14 = scalar_lea.vmem %s49_s18, 512  ;;  %p553_p6 = scmp.lt.s32.totalorder %s49_s18, %s49_s18 }
  0x2b   :  { %p549_p5 = scmp.ne.s32.totalorder %s49_s18, %s548_s14  ;;  %p554_p7 = scmp.lt.s32.totalorder %s548_s14, %s548_s14 }
  0x2d   :  { %p555_p8 = por %p554_p7, %p553_p6 }
  0x2f   :  { %p556_p9 = pnand %p555_p8, %p549_p5 }
  0x31   :  { %559 = shalt.err (!%p556_p9)
}
  0x32   :  { %54 = dma.hbm_to_vmem [thread:$0]  %s733_s5, 512, %s49_s18, [#allocation6], %s589_s11, %s589_s11, %s590_s12  }
  0x33   :  { %582 = dma.done.wait [#allocation3], 128  }
  0x34   :  { %583 = vsyncadd [#allocation3], 4294967168 }
  0x35   :  { %584 = dma.done.wait [#allocation6], 1536  }
  0x36   :  { %585 = vsyncadd [#allocation6], 4294965760  ;;  %v593_v0 = vmov 0.0|0.0   ;;  %vm594_vm0 = vmmov 0   ;;  %v595_v1 = vmov 0.0   ;;  %v67_v2 = vld [vmem:[#allocation5] sm:$0xff] }
  0x37   :  { %463 = vmatprep.subr.bf16.mxu0 %v593_v0  ;;  %438 = vmatprep.mubr.msk.f32.mxu0 %vm594_vm0, %v595_v1  ;;  %v68_v3 = vld [vmem:[#allocation5 + $0x8] sm:$0xff]  ;;  %v69_v4 = vld [vmem:[#allocation5 + $0x10] sm:$0xff]  ;;  %v70_v6 = vld [vmem:[#allocation5 + $0x18] sm:$0xff]  ;;  %vm78_vm1 = vcmask 261120   ;;  %s596_s1 = smov [#allocation8]  }
  0x38   :  { %469 = vmatprep.subr.bf16.mxu1 %v593_v0  ;;  %449 = vmatprep.mubr.msk.f32.mxu1 %vm594_vm0, %v595_v1  ;;  %v464_v5 = vpack.c.bf16 %v68_v3, %v67_v2  ;;  %v467_v7 = vpack.c.bf16 %v70_v6, %v69_v4  ;;  %v66_v8 = vld [vmem:[#allocation2] sm:$0xff]  ;;  %v184_v20 = vld [vmem:[#allocation5 + $0x20] sm:$0xff]  ;;  %v185_v21 = vld [vmem:[#allocation5 + $0x28] sm:$0xff]  ;;  %s392_s25 = sshll.u32 %s596_s1, 4  ;;  %s393_s25 = int_to_ptr.vmem [resolvable:$true] %s392_s25 }
  0x39   :  { %v402_v9 = vld [vmem:[%s730_s2] ss:$0 sm:$0xff]  ;;  %v186_v22 = vld [vmem:[#allocation5 + $0x30] sm:$0xff]  ;;  %v470_v23 = vpack.c.bf16 %v185_v21, %v184_v20  ;;  %v407_v35 = vld [vmem:[%s730_s2 + $0x1] ss:$0 sm:$0xff]  ;;  %p565_p11 = scmp.lt.s32.totalorder %s393_s25, %s393_s25 }
  0x3a   :  { %465 = vmatpush3.bf16.msra.mxu0 %v464_v5  ;;  %v187_v24 = vld [vmem:[#allocation5 + $0x38] sm:$0xff]  ;;  %v301_v46 = vld [vmem:[#allocation7] sm:$0xff]  ;;  %v302_v47 = vld [vmem:[#allocation7 + $0x8] sm:$0xff] }
  0x3b   :  { %466 = vmatprep.subr.bf16.mxu0 %v593_v0  ;;  %471 = vmatpush3.bf16.msra.mxu1 %v470_v23  ;;  %v473_v25 = vpack.c.bf16 %v187_v24, %v186_v22  ;;  %v404_v30 = vld [vmem:[%s731_s3] ss:$0 sm:$0xff]  ;;  %v476_v48 = vpack.c.bf16 %v302_v47, %v301_v46  ;;  %v303_v49 = vld [vmem:[#allocation7 + $0x10] sm:$0xff]  ;;  %v410_v56 = vld [vmem:[%s731_s3 + $0x1] ss:$0 sm:$0xff]  ;;  %s560_s3 = scalar_lea.vmem %s393_s25, 128 }
  0x3c   :  { %472 = vmatprep.subr.bf16.mxu1 %v593_v0  ;;  %v405_v32 = vld [vmem:[%s732_s4] ss:$0 sm:$0xff]  ;;  %v412_v58 = vld [vmem:[%s732_s4 + $0x1] ss:$0 sm:$0xff]  ;;  %p561_p10 = scmp.ne.s32.totalorder %s393_s25, %s560_s3  ;;  %p566_p12 = scmp.lt.s32.totalorder %s560_s3, %s560_s3 }
  0x3d   :  { %v304_v50 = vld [vmem:[#allocation7 + $0x18] sm:$0xff] }
  0x3e   :  { %468 = vmatpush3.bf16.msra.mxu0 %v467_v7  ;;  %v479_v51 = vpack.c.bf16 %v304_v50, %v303_v49  ;;  %v413_v61 = vld [vmem:[%s734_s6] ss:$0 sm:$0xff]  ;;  %p567_p13 = por %p566_p12, %p565_p11 }
  0x3f   :  { %475 = vmatprep.subr.bf16.mxu0 %v593_v0  ;;  %474 = vmatpush3.bf16.msra.mxu1 %v473_v25 }
  0x40   :  { %p568_p0 = pnand %p567_p13, %p561_p10 }
  0x41   :  { %439 = vmatmul.mubr.msk.f32.vlgmr.msra.gmra.mrb[0].mxu0 %vm78_vm1, %v66_v8 }
  0x42   :  { %460 = vmatprep.mubr.msk.f32.mxu0 %vm594_vm0, %v595_v1  ;;  %477 = vmatpush3.bf16.msra.mxu0 %v476_v48 }
  0x43   :  { %478 = vmatprep.subr.bf16.mxu0 %v593_v0 }
  0x46   :  { %480 = vmatpush3.bf16.msra.mxu0 %v479_v51 }
 0x114   :  { %v148_v10 = vpop.f32.mrb[0].mxu0 }
 0x115   :  { %v149_v11 = vadd.f32 %v402_v9, %v148_v10  ;;  %v440_v12 = vpop.f32.mrb[1].mxu0 }
 0x117   :  { %v152_v13 = vmax.f32 %v149_v11, 0.0 }
 0x119   :  { %v153_v14 = vsel %vm78_vm1, %v152_v13, 0.0 }
 0x11a   :  { %154 = vadd.xlane.f32.xlu0 %v153_v14 }
 0x1a7   :  { %v155_v15 = vpop.xlane.xlu0 %154 }
 0x1a8   :  { %v157_v16 = vmul.f32 0.03125, %v155_v15 }
 0x1aa   :  { %v158_v17 = vsub.f32 %v152_v13, %v157_v16 }
 0x1ac   :  { %v159_v18 = vmul.f32 %v158_v17, %v158_v17 }
 0x1ae   :  { %v160_v19 = vsel %vm78_vm1, %v159_v18, 0.0 }
 0x1af   :  { %161 = vadd.xlane.f32.xlu0 %v160_v19 }
 0x23c   :  { %v162_v26 = vpop.xlane.xlu0 %161 }
 0x23d   :  { %v163_v27 = vmul.f32 0.03125, %v162_v26 }
 0x23f   :  { %v164_v28 = vadd.f32 1e-05, %v163_v27 }
 0x241   :  { %490 = vrsqrt.f32 %v164_v28 }
 0x24b   :  { %v491_v29 = vpop.eup %490 }
 0x24c   :  { %v166_v31 = vmul.f32 %v491_v29, %v158_v17 }
 0x24e   :  { %v174_v33 = vmul.f32 %v404_v30, %v166_v31 }
 0x250   :  { %v182_v34 = vadd.f32 %v405_v32, %v174_v33 }
 0x252   :  { %450 = vmatmul.mubr.msk.f32.vlgmr.msra.gmra.mrb[0].mxu1 %vm78_vm1, %v182_v34 }
 0x325   :  { %v265_v36 = vpop.f32.mrb[0].mxu1 }
 0x326   :  { %v266_v37 = vadd.f32 %v407_v35, %v265_v36  ;;  %v451_v38 = vpop.f32.mrb[1].mxu1 }
 0x328   :  { %v269_v39 = vmax.f32 %v266_v37, 0.0 }
 0x32a   :  { %v270_v40 = vsel %vm78_vm1, %v269_v39, 0.0 }
 0x32b   :  { %271 = vadd.xlane.f32.xlu1 %v270_v40 }
 0x3b8   :  { %v272_v41 = vpop.xlane.xlu1 %271 }
 0x3b9   :  { %v273_v42 = vmul.f32 0.03125, %v272_v41 }
 0x3bb   :  { %v274_v43 = vsub.f32 %v269_v39, %v273_v42 }
 0x3bd   :  { %v275_v44 = vmul.f32 %v274_v43, %v274_v43 }
 0x3bf   :  { %v276_v45 = vsel %vm78_vm1, %v275_v44, 0.0 }
 0x3c0   :  { %277 = vadd.xlane.f32.xlu1 %v276_v45 }
 0x44d   :  { %v278_v52 = vpop.xlane.xlu1 %277 }
 0x44e   :  { %v279_v53 = vmul.f32 0.03125, %v278_v52 }
 0x450   :  { %v280_v54 = vadd.f32 1e-05, %v279_v53 }
 0x452   :  { %492 = vrsqrt.f32 %v280_v54 }
 0x45c   :  { %v493_v55 = vpop.eup %492 }
 0x45d   :  { %v282_v57 = vmul.f32 %v493_v55, %v274_v43 }
 0x45f   :  { %v291_v59 = vmul.f32 %v410_v56, %v282_v57 }
 0x461   :  { %v300_v60 = vadd.f32 %v412_v58, %v291_v59 }
 0x463   :  { %461 = vmatmul.mubr.msk.f32.vlgmr.msra.gmra.mrb[2].mxu0 %vm78_vm1, %v300_v60 }
 0x536   :  { %v381_v62 = vpop.f32.mrb[2].mxu0 }
 0x537   :  { %v382_v63 = vadd.f32 %v413_v61, %v381_v62  ;;  %v462_v0 = vpop.f32.mrb[3].mxu0 }
 0x539   :  { %385 = vst [vmem:[#allocation8] sm:$0xff] %v382_v63 }
 0x53a   :  { %571 = shalt.err (!%p568_p0)
}
 0x53b   :  { %s572_s28 = scalar_lea.hbm %s735_s7, 128 }
 0x53c   :  { %p573_p1 = scmp.ne.s32.totalorder %s735_s7, %s572_s28  ;;  %p576_p2 = scmp.lt.u32.totalorder %s572_s28, %s735_s7 }
 0x53e   :  { %p578_p3 = pnand %p576_p2, %p573_p1 }
 0x540   :  { %581 = shalt.err (!%p578_p3)
}
 0x541   :  { %395 = dma.vmem_to_hbm [thread:$0]  %s393_s25, 128, %s735_s7, [#allocation4]  }
 0x542   :  { %586 = dma.done.wait [#allocation4], 128  }
 0x543   :  { %587 = vsyncadd [#allocation4], 4294967168 }
 0x544   :  { %399 = vsyncpa [#allocation3], 1 }
 0x545   :  { %400 = vsyncpa [#allocation6], 1 }
 0x546   :  { %401 = vsyncpa [#allocation4], 1 }

</bundles_post_ra>
